<compile_context>
chip_gen: v7x
topology: tpu7x:2x2x1
jax: 0.10.0
libtpu: 0.0.40
codegen_flags: <defaults>
</compile_context>

<pallas_src>
import jax
import jax.numpy as jnp
from jax.experimental import pallas as pl
from jax.experimental.pallas import tpu as pltpu

N_STATES = 2      # Maze.n_features
N_ACTIONS = 4     # Maze.n_actions (up/down/left/right)
HIDDEN = 10

# Flat SMEM parameter layout: [w1 (row-major) | b1 | w2 (row-major) | b2]
W1_OFF = 0
B1_OFF = W1_OFF + N_STATES * HIDDEN       # 20
W2_OFF = B1_OFF + HIDDEN                  # 30
B2_OFF = W2_OFF + HIDDEN * N_ACTIONS      # 70
P_LEN = B2_OFF + N_ACTIONS                # 74 f32 scalars (~296 B in SMEM)


def _round_up(n, m):
    return ((n + m - 1) // m) * m


def _net_kernel(xT_ref, p_ref, o_ref):
    """xT_ref: (N_STATES, TB) f32 VMEM  -- batch along lanes.
    p_ref:  (P_LEN,)       f32 SMEM  -- flat w1|b1|w2|b2 scalars.
    o_ref:  (N_ACTIONS, TB) f32 VMEM -- q-values, batch along lanes."""
    x_rows = [xT_ref[k:k + 1, :] for k in range(N_STATES)]        # (1, TB) each

    # ---- fc1 + ReLU: h[j, :] = relu(sum_k w1[k, j] * x[k, :] + b1[j])
    h_rows = []
    for j in range(HIDDEN):                                        # unrolled at trace time
        hj = x_rows[0] * p_ref[W1_OFF + 0 * HIDDEN + j]
        for k in range(1, N_STATES):
            hj = hj + x_rows[k] * p_ref[W1_OFF + k * HIDDEN + j]
        hj = hj + p_ref[B1_OFF + j]
        h_rows.append(jnp.maximum(hj, 0.0))

    # ---- out: y[a, :] = sum_j w2[j, a] * h[j, :] + b2[a]
    for a in range(N_ACTIONS):
        ya = h_rows[0] * p_ref[W2_OFF + 0 * N_ACTIONS + a]
        for j in range(1, HIDDEN):
            ya = ya + h_rows[j] * p_ref[W2_OFF + j * N_ACTIONS + a]
        ya = ya + p_ref[B2_OFF + a]
        o_ref[a:a + 1, :] = ya.astype(o_ref.dtype)


def pack_params(w1, b1, w2, b2):
    """Pack all parameters into one flat (P_LEN,) f32 vector (lives in SMEM).
    w1: (N_STATES, HIDDEN), b1: (HIDDEN,), w2: (HIDDEN, N_ACTIONS), b2: (N_ACTIONS,)."""
    return jnp.concatenate([
        w1.astype(jnp.float32).reshape(-1),
        b1.astype(jnp.float32).reshape(-1),
        w2.astype(jnp.float32).reshape(-1),
        b2.astype(jnp.float32).reshape(-1),
    ])


def net_forward(x, packed_params):
    """x: (B, N_STATES); packed_params: (P_LEN,) f32 from pack_params.
    Returns (B, N_ACTIONS) f32 action values."""
    B = x.shape[0]
    xT = x.astype(jnp.float32).T                       # (N_STATES, B)

    if B <= 1024:
        # Small-B fast path: one grid step, full-extent blocks -> no padding,
        # no output slice (legal: block dims equal full array dims).
        TB = B
        Bp = B
    else:
        # Large B: lane tiles of 1024/4096 rows; grid >= 2 so the parallel
        # batch axis can shard across both v7x TensorCores. Double-buffered
        # working set stays well under 1 MiB on every generation.
        TB = 1024 if B <= 8192 else 4096
        Bp = _round_up(B, TB)
        xT = jnp.pad(xT, ((0, 0), (0, Bp - B)))

    outT = pl.pallas_call(
        _net_kernel,
        out_shape=jax.ShapeDtypeStruct((N_ACTIONS, Bp), jnp.float32),
        grid_spec=pltpu.PrefetchScalarGridSpec(
            num_scalar_prefetch=0,
            grid=(Bp // TB,),
            in_specs=[
                # batch tile of states, batch along lanes
                pl.BlockSpec((N_STATES, TB), lambda i: (0, i)),
                # all 74 parameters as scalars in SMEM (invariant operand)
                pl.BlockSpec(memory_space=pltpu.MemorySpace.SMEM),
            ],
            out_specs=pl.BlockSpec((N_ACTIONS, TB), lambda i: (0, i)),
        ),
        compiler_params=pltpu.CompilerParams(
            # Batch axis is independent -> shards across v7x's 2 TensorCores;
            # harmless no-op on single-core v5e/v6e.
            dimension_semantics=("parallel",),
        ),
    )(xT, packed_params)                               # (N_ACTIONS, Bp)

    if Bp != B:
        outT = outT[:, :B]
    return outT.T                                      # (B, N_ACTIONS)


def init_params(key):
    """Mirrors the PyTorch module init: weights ~ Normal(0, 0.1); biases use
    nn.Linear's default Uniform(-1/sqrt(fan_in), 1/sqrt(fan_in))."""
    k1, k2, k3, k4 = jax.random.split(key, 4)
    w1 = 0.1 * jax.random.normal(k1, (N_STATES, HIDDEN), jnp.float32)
    b1 = jax.random.uniform(k2, (HIDDEN,), jnp.float32,
                            minval=-1.0 / jnp.sqrt(N_STATES),
                            maxval=1.0 / jnp.sqrt(N_STATES))
    w2 = 0.1 * jax.random.normal(k3, (HIDDEN, N_ACTIONS), jnp.float32)
    b2 = jax.random.uniform(k4, (N_ACTIONS,), jnp.float32,
                            minval=-1.0 / jnp.sqrt(HIDDEN),
                            maxval=1.0 / jnp.sqrt(HIDDEN))
    return w1, b1, w2, b2


def reference_forward(x, w1, b1, w2, b2):
    h = jnp.maximum(x @ w1 + b1, 0.0)
    return h @ w2 + b2


if __name__ == "__main__":
    key = jax.random.PRNGKey(0)
    kx, kp = jax.random.split(key)
    w1, b1, w2, b2 = init_params(kp)
    packed = pack_params(w1, b1, w2, b2)

    # Exercise the DQN call-site shapes (B=1 choose_action, B=32 learn) and
    # the padded multi-tile grid path (B=2500).
    for B in (1, 32, 2500):
        xb = jax.random.normal(jax.random.fold_in(kx, B), (B, N_STATES), jnp.float32)
        actions_value = net_forward(xb, packed)
        jax.block_until_ready(actions_value)
        ref = reference_forward(xb, w1, b1, w2, b2)
        assert actions_value.shape == (B, N_ACTIONS)
        assert jnp.allclose(actions_value, ref, atol=1e-5, rtol=1e-5)

    print("KERNEL_OK")
</pallas_src>

<mosaic_0001>
module attributes {stable_mosaic.version = 11 : i64} {
  func.func @_net_kernel(%arg0: i32, %arg1: memref<2x1xf32, #tpu.memory_space<vmem>>, %arg2: memref<74xf32, #tpu.memory_space<smem>>, %arg3: memref<4x1xf32, #tpu.memory_space<vmem>>) attributes {dimension_semantics = [#tpu.dimension_semantics<parallel>], iteration_bounds = array<i64: 1>, scalar_prefetch = 0 : i64, scratch_operands = 0 : i64, tpu.core_type = #tpu.core_type<tc>, window_params = [{transform_indices = @transform_0, window_bounds = array<i64: 2, 1>}, {transform_indices = @transform_1, window_bounds = array<i64: 74>}, {transform_indices = @transform_2, window_bounds = array<i64: 4, 1>}]} {
    %c0 = arith.constant 0 : index
    %c0_0 = arith.constant 0 : index
    %0 = vector.load %arg1[%c0, %c0_0] : memref<2x1xf32, #tpu.memory_space<vmem>>, vector<1x1xf32>
    %c1 = arith.constant 1 : index
    %c0_1 = arith.constant 0 : index
    %1 = vector.load %arg1[%c1, %c0_1] : memref<2x1xf32, #tpu.memory_space<vmem>>, vector<1x1xf32>
    %c0_2 = arith.constant 0 : index
    %2 = memref.load %arg2[%c0_2] : memref<74xf32, #tpu.memory_space<smem>>
    %3 = vector.broadcast %2 : f32 to vector<1x1xf32>
    %4 = arith.mulf %0, %3 : vector<1x1xf32>
    %c10 = arith.constant 10 : index
    %5 = memref.load %arg2[%c10] : memref<74xf32, #tpu.memory_space<smem>>
    %6 = vector.broadcast %5 : f32 to vector<1x1xf32>
    %7 = arith.mulf %1, %6 : vector<1x1xf32>
    %8 = arith.addf %4, %7 : vector<1x1xf32>
    %c20 = arith.constant 20 : index
    %9 = memref.load %arg2[%c20] : memref<74xf32, #tpu.memory_space<smem>>
    %10 = vector.broadcast %9 : f32 to vector<1x1xf32>
    %11 = arith.addf %8, %10 : vector<1x1xf32>
    %cst = arith.constant 0.000000e+00 : f32
    %12 = vector.broadcast %cst : f32 to vector<1x1xf32>
    %13 = arith.maximumf %11, %12 : vector<1x1xf32>
    %c1_3 = arith.constant 1 : index
    %14 = memref.load %arg2[%c1_3] : memref<74xf32, #tpu.memory_space<smem>>
    %15 = vector.broadcast %14 : f32 to vector<1x1xf32>
    %16 = arith.mulf %0, %15 : vector<1x1xf32>
    %c11 = arith.constant 11 : index
    %17 = memref.load %arg2[%c11] : memref<74xf32, #tpu.memory_space<smem>>
    %18 = vector.broadcast %17 : f32 to vector<1x1xf32>
    %19 = arith.mulf %1, %18 : vector<1x1xf32>
    %20 = arith.addf %16, %19 : vector<1x1xf32>
    %c21 = arith.constant 21 : index
    %21 = memref.load %arg2[%c21] : memref<74xf32, #tpu.memory_space<smem>>
    %22 = vector.broadcast %21 : f32 to vector<1x1xf32>
    %23 = arith.addf %20, %22 : vector<1x1xf32>
    %cst_4 = arith.constant 0.000000e+00 : f32
    %24 = vector.broadcast %cst_4 : f32 to vector<1x1xf32>
    %25 = arith.maximumf %23, %24 : vector<1x1xf32>
    %c2 = arith.constant 2 : index
    %26 = memref.load %arg2[%c2] : memref<74xf32, #tpu.memory_space<smem>>
    %27 = vector.broadcast %26 : f32 to vector<1x1xf32>
    %28 = arith.mulf %0, %27 : vector<1x1xf32>
    %c12 = arith.constant 12 : index
    %29 = memref.load %arg2[%c12] : memref<74xf32, #tpu.memory_space<smem>>
    %30 = vector.broadcast %29 : f32 to vector<1x1xf32>
    %31 = arith.mulf %1, %30 : vector<1x1xf32>
    %32 = arith.addf %28, %31 : vector<1x1xf32>
    %c22 = arith.constant 22 : index
    %33 = memref.load %arg2[%c22] : memref<74xf32, #tpu.memory_space<smem>>
    %34 = vector.broadcast %33 : f32 to vector<1x1xf32>
    %35 = arith.addf %32, %34 : vector<1x1xf32>
    %cst_5 = arith.constant 0.000000e+00 : f32
    %36 = vector.broadcast %cst_5 : f32 to vector<1x1xf32>
    %37 = arith.maximumf %35, %36 : vector<1x1xf32>
    %c3 = arith.constant 3 : index
    %38 = memref.load %arg2[%c3] : memref<74xf32, #tpu.memory_space<smem>>
    %39 = vector.broadcast %38 : f32 to vector<1x1xf32>
    %40 = arith.mulf %0, %39 : vector<1x1xf32>
    %c13 = arith.constant 13 : index
    %41 = memref.load %arg2[%c13] : memref<74xf32, #tpu.memory_space<smem>>
    %42 = vector.broadcast %41 : f32 to vector<1x1xf32>
    %43 = arith.mulf %1, %42 : vector<1x1xf32>
    %44 = arith.addf %40, %43 : vector<1x1xf32>
    %c23 = arith.constant 23 : index
    %45 = memref.load %arg2[%c23] : memref<74xf32, #tpu.memory_space<smem>>
    %46 = vector.broadcast %45 : f32 to vector<1x1xf32>
    %47 = arith.addf %44, %46 : vector<1x1xf32>
    %cst_6 = arith.constant 0.000000e+00 : f32
    %48 = vector.broadcast %cst_6 : f32 to vector<1x1xf32>
    %49 = arith.maximumf %47, %48 : vector<1x1xf32>
    %c4 = arith.constant 4 : index
    %50 = memref.load %arg2[%c4] : memref<74xf32, #tpu.memory_space<smem>>
    %51 = vector.broadcast %50 : f32 to vector<1x1xf32>
    %52 = arith.mulf %0, %51 : vector<1x1xf32>
    %c14 = arith.constant 14 : index
    %53 = memref.load %arg2[%c14] : memref<74xf32, #tpu.memory_space<smem>>
    %54 = vector.broadcast %53 : f32 to vector<1x1xf32>
    %55 = arith.mulf %1, %54 : vector<1x1xf32>
    %56 = arith.addf %52, %55 : vector<1x1xf32>
    %c24 = arith.constant 24 : index
    %57 = memref.load %arg2[%c24] : memref<74xf32, #tpu.memory_space<smem>>
    %58 = vector.broadcast %57 : f32 to vector<1x1xf32>
    %59 = arith.addf %56, %58 : vector<1x1xf32>
    %cst_7 = arith.constant 0.000000e+00 : f32
    %60 = vector.broadcast %cst_7 : f32 to vector<1x1xf32>
    %61 = arith.maximumf %59, %60 : vector<1x1xf32>
    %c5 = arith.constant 5 : index
    %62 = memref.load %arg2[%c5] : memref<74xf32, #tpu.memory_space<smem>>
    %63 = vector.broadcast %62 : f32 to vector<1x1xf32>
    %64 = arith.mulf %0, %63 : vector<1x1xf32>
    %c15 = arith.constant 15 : index
    %65 = memref.load %arg2[%c15] : memref<74xf32, #tpu.memory_space<smem>>
    %66 = vector.broadcast %65 : f32 to vector<1x1xf32>
    %67 = arith.mulf %1, %66 : vector<1x1xf32>
    %68 = arith.addf %64, %67 : vector<1x1xf32>
    %c25 = arith.constant 25 : index
    %69 = memref.load %arg2[%c25] : memref<74xf32, #tpu.memory_space<smem>>
    %70 = vector.broadcast %69 : f32 to vector<1x1xf32>
    %71 = arith.addf %68, %70 : vector<1x1xf32>
    %cst_8 = arith.constant 0.000000e+00 : f32
    %72 = vector.broadcast %cst_8 : f32 to vector<1x1xf32>
    %73 = arith.maximumf %71, %72 : vector<1x1xf32>
    %c6 = arith.constant 6 : index
    %74 = memref.load %arg2[%c6] : memref<74xf32, #tpu.memory_space<smem>>
    %75 = vector.broadcast %74 : f32 to vector<1x1xf32>
    %76 = arith.mulf %0, %75 : vector<1x1xf32>
    %c16 = arith.constant 16 : index
    %77 = memref.load %arg2[%c16] : memref<74xf32, #tpu.memory_space<smem>>
    %78 = vector.broadcast %77 : f32 to vector<1x1xf32>
    %79 = arith.mulf %1, %78 : vector<1x1xf32>
    %80 = arith.addf %76, %79 : vector<1x1xf32>
    %c26 = arith.constant 26 : index
    %81 = memref.load %arg2[%c26] : memref<74xf32, #tpu.memory_space<smem>>
    %82 = vector.broadcast %81 : f32 to vector<1x1xf32>
    %83 = arith.addf %80, %82 : vector<1x1xf32>
    %cst_9 = arith.constant 0.000000e+00 : f32
    %84 = vector.broadcast %cst_9 : f32 to vector<1x1xf32>
    %85 = arith.maximumf %83, %84 : vector<1x1xf32>
    %c7 = arith.constant 7 : index
    %86 = memref.load %arg2[%c7] : memref<74xf32, #tpu.memory_space<smem>>
    %87 = vector.broadcast %86 : f32 to vector<1x1xf32>
    %88 = arith.mulf %0, %87 : vector<1x1xf32>
    %c17 = arith.constant 17 : index
    %89 = memref.load %arg2[%c17] : memref<74xf32, #tpu.memory_space<smem>>
    %90 = vector.broadcast %89 : f32 to vector<1x1xf32>
    %91 = arith.mulf %1, %90 : vector<1x1xf32>
    %92 = arith.addf %88, %91 : vector<1x1xf32>
    %c27 = arith.constant 27 : index
    %93 = memref.load %arg2[%c27] : memref<74xf32, #tpu.memory_space<smem>>
    %94 = vector.broadcast %93 : f32 to vector<1x1xf32>
    %95 = arith.addf %92, %94 : vector<1x1xf32>
    %cst_10 = arith.constant 0.000000e+00 : f32
    %96 = vector.broadcast %cst_10 : f32 to vector<1x1xf32>
    %97 = arith.maximumf %95, %96 : vector<1x1xf32>
    %c8 = arith.constant 8 : index
    %98 = memref.load %arg2[%c8] : memref<74xf32, #tpu.memory_space<smem>>
    %99 = vector.broadcast %98 : f32 to vector<1x1xf32>
    %100 = arith.mulf %0, %99 : vector<1x1xf32>
    %c18 = arith.constant 18 : index
    %101 = memref.load %arg2[%c18] : memref<74xf32, #tpu.memory_space<smem>>
    %102 = vector.broadcast %101 : f32 to vector<1x1xf32>
    %103 = arith.mulf %1, %102 : vector<1x1xf32>
    %104 = arith.addf %100, %103 : vector<1x1xf32>
    %c28 = arith.constant 28 : index
    %105 = memref.load %arg2[%c28] : memref<74xf32, #tpu.memory_space<smem>>
    %106 = vector.broadcast %105 : f32 to vector<1x1xf32>
    %107 = arith.addf %104, %106 : vector<1x1xf32>
    %cst_11 = arith.constant 0.000000e+00 : f32
    %108 = vector.broadcast %cst_11 : f32 to vector<1x1xf32>
    %109 = arith.maximumf %107, %108 : vector<1x1xf32>
    %c9 = arith.constant 9 : index
    %110 = memref.load %arg2[%c9] : memref<74xf32, #tpu.memory_space<smem>>
    %111 = vector.broadcast %110 : f32 to vector<1x1xf32>
    %112 = arith.mulf %0, %111 : vector<1x1xf32>
    %c19 = arith.constant 19 : index
    %113 = memref.load %arg2[%c19] : memref<74xf32, #tpu.memory_space<smem>>
    %114 = vector.broadcast %113 : f32 to vector<1x1xf32>
    %115 = arith.mulf %1, %114 : vector<1x1xf32>
    %116 = arith.addf %112, %115 : vector<1x1xf32>
    %c29 = arith.constant 29 : index
    %117 = memref.load %arg2[%c29] : memref<74xf32, #tpu.memory_space<smem>>
    %118 = vector.broadcast %117 : f32 to vector<1x1xf32>
    %119 = arith.addf %116, %118 : vector<1x1xf32>
    %cst_12 = arith.constant 0.000000e+00 : f32
    %120 = vector.broadcast %cst_12 : f32 to vector<1x1xf32>
    %121 = arith.maximumf %119, %120 : vector<1x1xf32>
    %c30 = arith.constant 30 : index
    %122 = memref.load %arg2[%c30] : memref<74xf32, #tpu.memory_space<smem>>
    %123 = vector.broadcast %122 : f32 to vector<1x1xf32>
    %124 = arith.mulf %13, %123 : vector<1x1xf32>
    %c34 = arith.constant 34 : index
    %125 = memref.load %arg2[%c34] : memref<74xf32, #tpu.memory_space<smem>>
    %126 = vector.broadcast %125 : f32 to vector<1x1xf32>
    %127 = arith.mulf %25, %126 : vector<1x1xf32>
    %128 = arith.addf %124, %127 : vector<1x1xf32>
    %c38 = arith.constant 38 : index
    %129 = memref.load %arg2[%c38] : memref<74xf32, #tpu.memory_space<smem>>
    %130 = vector.broadcast %129 : f32 to vector<1x1xf32>
    %131 = arith.mulf %37, %130 : vector<1x1xf32>
    %132 = arith.addf %128, %131 : vector<1x1xf32>
    %c42 = arith.constant 42 : index
    %133 = memref.load %arg2[%c42] : memref<74xf32, #tpu.memory_space<smem>>
    %134 = vector.broadcast %133 : f32 to vector<1x1xf32>
    %135 = arith.mulf %49, %134 : vector<1x1xf32>
    %136 = arith.addf %132, %135 : vector<1x1xf32>
    %c46 = arith.constant 46 : index
    %137 = memref.load %arg2[%c46] : memref<74xf32, #tpu.memory_space<smem>>
    %138 = vector.broadcast %137 : f32 to vector<1x1xf32>
    %139 = arith.mulf %61, %138 : vector<1x1xf32>
    %140 = arith.addf %136, %139 : vector<1x1xf32>
    %c50 = arith.constant 50 : index
    %141 = memref.load %arg2[%c50] : memref<74xf32, #tpu.memory_space<smem>>
    %142 = vector.broadcast %141 : f32 to vector<1x1xf32>
    %143 = arith.mulf %73, %142 : vector<1x1xf32>
    %144 = arith.addf %140, %143 : vector<1x1xf32>
    %c54 = arith.constant 54 : index
    %145 = memref.load %arg2[%c54] : memref<74xf32, #tpu.memory_space<smem>>
    %146 = vector.broadcast %145 : f32 to vector<1x1xf32>
    %147 = arith.mulf %85, %146 : vector<1x1xf32>
    %148 = arith.addf %144, %147 : vector<1x1xf32>
    %c58 = arith.constant 58 : index
    %149 = memref.load %arg2[%c58] : memref<74xf32, #tpu.memory_space<smem>>
    %150 = vector.broadcast %149 : f32 to vector<1x1xf32>
    %151 = arith.mulf %97, %150 : vector<1x1xf32>
    %152 = arith.addf %148, %151 : vector<1x1xf32>
    %c62 = arith.constant 62 : index
    %153 = memref.load %arg2[%c62] : memref<74xf32, #tpu.memory_space<smem>>
    %154 = vector.broadcast %153 : f32 to vector<1x1xf32>
    %155 = arith.mulf %109, %154 : vector<1x1xf32>
    %156 = arith.addf %152, %155 : vector<1x1xf32>
    %c66 = arith.constant 66 : index
    %157 = memref.load %arg2[%c66] : memref<74xf32, #tpu.memory_space<smem>>
    %158 = vector.broadcast %157 : f32 to vector<1x1xf32>
    %159 = arith.mulf %121, %158 : vector<1x1xf32>
    %160 = arith.addf %156, %159 : vector<1x1xf32>
    %c70 = arith.constant 70 : index
    %161 = memref.load %arg2[%c70] : memref<74xf32, #tpu.memory_space<smem>>
    %162 = vector.broadcast %161 : f32 to vector<1x1xf32>
    %163 = arith.addf %160, %162 : vector<1x1xf32>
    %c0_13 = arith.constant 0 : index
    %c0_14 = arith.constant 0 : index
    %164 = vector.load %arg3[%c0_13, %c0_14] : memref<4x1xf32, #tpu.memory_space<vmem>>, vector<1x1xf32>
    tpu.vector_store %arg3[%c0_13, %c0_14], %163 {strides = array<i32>} : memref<4x1xf32, #tpu.memory_space<vmem>>, vector<1x1xf32>,
    %c31 = arith.constant 31 : index
    %165 = memref.load %arg2[%c31] : memref<74xf32, #tpu.memory_space<smem>>
    %166 = vector.broadcast %165 : f32 to vector<1x1xf32>
    %167 = arith.mulf %13, %166 : vector<1x1xf32>
    %c35 = arith.constant 35 : index
    %168 = memref.load %arg2[%c35] : memref<74xf32, #tpu.memory_space<smem>>
    %169 = vector.broadcast %168 : f32 to vector<1x1xf32>
    %170 = arith.mulf %25, %169 : vector<1x1xf32>
    %171 = arith.addf %167, %170 : vector<1x1xf32>
    %c39 = arith.constant 39 : index
    %172 = memref.load %arg2[%c39] : memref<74xf32, #tpu.memory_space<smem>>
    %173 = vector.broadcast %172 : f32 to vector<1x1xf32>
    %174 = arith.mulf %37, %173 : vector<1x1xf32>
    %175 = arith.addf %171, %174 : vector<1x1xf32>
    %c43 = arith.constant 43 : index
    %176 = memref.load %arg2[%c43] : memref<74xf32, #tpu.memory_space<smem>>
    %177 = vector.broadcast %176 : f32 to vector<1x1xf32>
    %178 = arith.mulf %49, %177 : vector<1x1xf32>
    %179 = arith.addf %175, %178 : vector<1x1xf32>
    %c47 = arith.constant 47 : index
    %180 = memref.load %arg2[%c47] : memref<74xf32, #tpu.memory_space<smem>>
    %181 = vector.broadcast %180 : f32 to vector<1x1xf32>
    %182 = arith.mulf %61, %181 : vector<1x1xf32>
    %183 = arith.addf %179, %182 : vector<1x1xf32>
    %c51 = arith.constant 51 : index
    %184 = memref.load %arg2[%c51] : memref<74xf32, #tpu.memory_space<smem>>
    %185 = vector.broadcast %184 : f32 to vector<1x1xf32>
    %186 = arith.mulf %73, %185 : vector<1x1xf32>
    %187 = arith.addf %183, %186 : vector<1x1xf32>
    %c55 = arith.constant 55 : index
    %188 = memref.load %arg2[%c55] : memref<74xf32, #tpu.memory_space<smem>>
    %189 = vector.broadcast %188 : f32 to vector<1x1xf32>
    %190 = arith.mulf %85, %189 : vector<1x1xf32>
    %191 = arith.addf %187, %190 : vector<1x1xf32>
    %c59 = arith.constant 59 : index
    %192 = memref.load %arg2[%c59] : memref<74xf32, #tpu.memory_space<smem>>
    %193 = vector.broadcast %192 : f32 to vector<1x1xf32>
    %194 = arith.mulf %97, %193 : vector<1x1xf32>
    %195 = arith.addf %191, %194 : vector<1x1xf32>
    %c63 = arith.constant 63 : index
    %196 = memref.load %arg2[%c63] : memref<74xf32, #tpu.memory_space<smem>>
    %197 = vector.broadcast %196 : f32 to vector<1x1xf32>
    %198 = arith.mulf %109, %197 : vector<1x1xf32>
    %199 = arith.addf %195, %198 : vector<1x1xf32>
    %c67 = arith.constant 67 : index
    %200 = memref.load %arg2[%c67] : memref<74xf32, #tpu.memory_space<smem>>
    %201 = vector.broadcast %200 : f32 to vector<1x1xf32>
    %202 = arith.mulf %121, %201 : vector<1x1xf32>
    %203 = arith.addf %199, %202 : vector<1x1xf32>
    %c71 = arith.constant 71 : index
    %204 = memref.load %arg2[%c71] : memref<74xf32, #tpu.memory_space<smem>>
    %205 = vector.broadcast %204 : f32 to vector<1x1xf32>
    %206 = arith.addf %203, %205 : vector<1x1xf32>
    %c1_15 = arith.constant 1 : index
    %c0_16 = arith.constant 0 : index
    %207 = vector.load %arg3[%c1_15, %c0_16] : memref<4x1xf32, #tpu.memory_space<vmem>>, vector<1x1xf32>
    tpu.vector_store %arg3[%c1_15, %c0_16], %206 {strides = array<i32>} : memref<4x1xf32, #tpu.memory_space<vmem>>, vector<1x1xf32>,
    %c32 = arith.constant 32 : index
    %208 = memref.load %arg2[%c32] : memref<74xf32, #tpu.memory_space<smem>>
    %209 = vector.broadcast %208 : f32 to vector<1x1xf32>
    %210 = arith.mulf %13, %209 : vector<1x1xf32>
    %c36 = arith.constant 36 : index
    %211 = memref.load %arg2[%c36] : memref<74xf32, #tpu.memory_space<smem>>
    %212 = vector.broadcast %211 : f32 to vector<1x1xf32>
    %213 = arith.mulf %25, %212 : vector<1x1xf32>
    %214 = arith.addf %210, %213 : vector<1x1xf32>
    %c40 = arith.constant 40 : index
    %215 = memref.load %arg2[%c40] : memref<74xf32, #tpu.memory_space<smem>>
    %216 = vector.broadcast %215 : f32 to vector<1x1xf32>
    %217 = arith.mulf %37, %216 : vector<1x1xf32>
    %218 = arith.addf %214, %217 : vector<1x1xf32>
    %c44 = arith.constant 44 : index
    %219 = memref.load %arg2[%c44] : memref<74xf32, #tpu.memory_space<smem>>
    %220 = vector.broadcast %219 : f32 to vector<1x1xf32>
    %221 = arith.mulf %49, %220 : vector<1x1xf32>
    %222 = arith.addf %218, %221 : vector<1x1xf32>
    %c48 = arith.constant 48 : index
    %223 = memref.load %arg2[%c48] : memref<74xf32, #tpu.memory_space<smem>>
    %224 = vector.broadcast %223 : f32 to vector<1x1xf32>
    %225 = arith.mulf %61, %224 : vector<1x1xf32>
    %226 = arith.addf %222, %225 : vector<1x1xf32>
    %c52 = arith.constant 52 : index
    %227 = memref.load %arg2[%c52] : memref<74xf32, #tpu.memory_space<smem>>
    %228 = vector.broadcast %227 : f32 to vector<1x1xf32>
    %229 = arith.mulf %73, %228 : vector<1x1xf32>
    %230 = arith.addf %226, %229 : vector<1x1xf32>
    %c56 = arith.constant 56 : index
    %231 = memref.load %arg2[%c56] : memref<74xf32, #tpu.memory_space<smem>>
    %232 = vector.broadcast %231 : f32 to vector<1x1xf32>
    %233 = arith.mulf %85, %232 : vector<1x1xf32>
    %234 = arith.addf %230, %233 : vector<1x1xf32>
    %c60 = arith.constant 60 : index
    %235 = memref.load %arg2[%c60] : memref<74xf32, #tpu.memory_space<smem>>
    %236 = vector.broadcast %235 : f32 to vector<1x1xf32>
    %237 = arith.mulf %97, %236 : vector<1x1xf32>
    %238 = arith.addf %234, %237 : vector<1x1xf32>
    %c64 = arith.constant 64 : index
    %239 = memref.load %arg2[%c64] : memref<74xf32, #tpu.memory_space<smem>>
    %240 = vector.broadcast %239 : f32 to vector<1x1xf32>
    %241 = arith.mulf %109, %240 : vector<1x1xf32>
    %242 = arith.addf %238, %241 : vector<1x1xf32>
    %c68 = arith.constant 68 : index
    %243 = memref.load %arg2[%c68] : memref<74xf32, #tpu.memory_space<smem>>
    %244 = vector.broadcast %243 : f32 to vector<1x1xf32>
    %245 = arith.mulf %121, %244 : vector<1x1xf32>
    %246 = arith.addf %242, %245 : vector<1x1xf32>
    %c72 = arith.constant 72 : index
    %247 = memref.load %arg2[%c72] : memref<74xf32, #tpu.memory_space<smem>>
    %248 = vector.broadcast %247 : f32 to vector<1x1xf32>
    %249 = arith.addf %246, %248 : vector<1x1xf32>
    %c2_17 = arith.constant 2 : index
    %c0_18 = arith.constant 0 : index
    %250 = vector.load %arg3[%c2_17, %c0_18] : memref<4x1xf32, #tpu.memory_space<vmem>>, vector<1x1xf32>
    tpu.vector_store %arg3[%c2_17, %c0_18], %249 {strides = array<i32>} : memref<4x1xf32, #tpu.memory_space<vmem>>, vector<1x1xf32>,
    %c33 = arith.constant 33 : index
    %251 = memref.load %arg2[%c33] : memref<74xf32, #tpu.memory_space<smem>>
    %252 = vector.broadcast %251 : f32 to vector<1x1xf32>
    %253 = arith.mulf %13, %252 : vector<1x1xf32>
    %c37 = arith.constant 37 : index
    %254 = memref.load %arg2[%c37] : memref<74xf32, #tpu.memory_space<smem>>
    %255 = vector.broadcast %254 : f32 to vector<1x1xf32>
    %256 = arith.mulf %25, %255 : vector<1x1xf32>
    %257 = arith.addf %253, %256 : vector<1x1xf32>
    %c41 = arith.constant 41 : index
    %258 = memref.load %arg2[%c41] : memref<74xf32, #tpu.memory_space<smem>>
    %259 = vector.broadcast %258 : f32 to vector<1x1xf32>
    %260 = arith.mulf %37, %259 : vector<1x1xf32>
    %261 = arith.addf %257, %260 : vector<1x1xf32>
    %c45 = arith.constant 45 : index
    %262 = memref.load %arg2[%c45] : memref<74xf32, #tpu.memory_space<smem>>
    %263 = vector.broadcast %262 : f32 to vector<1x1xf32>
    %264 = arith.mulf %49, %263 : vector<1x1xf32>
    %265 = arith.addf %261, %264 : vector<1x1xf32>
    %c49 = arith.constant 49 : index
    %266 = memref.load %arg2[%c49] : memref<74xf32, #tpu.memory_space<smem>>
    %267 = vector.broadcast %266 : f32 to vector<1x1xf32>
    %268 = arith.mulf %61, %267 : vector<1x1xf32>
    %269 = arith.addf %265, %268 : vector<1x1xf32>
    %c53 = arith.constant 53 : index
    %270 = memref.load %arg2[%c53] : memref<74xf32, #tpu.memory_space<smem>>
    %271 = vector.broadcast %270 : f32 to vector<1x1xf32>
    %272 = arith.mulf %73, %271 : vector<1x1xf32>
    %273 = arith.addf %269, %272 : vector<1x1xf32>
    %c57 = arith.constant 57 : index
    %274 = memref.load %arg2[%c57] : memref<74xf32, #tpu.memory_space<smem>>
    %275 = vector.broadcast %274 : f32 to vector<1x1xf32>
    %276 = arith.mulf %85, %275 : vector<1x1xf32>
    %277 = arith.addf %273, %276 : vector<1x1xf32>
    %c61 = arith.constant 61 : index
    %278 = memref.load %arg2[%c61] : memref<74xf32, #tpu.memory_space<smem>>
    %279 = vector.broadcast %278 : f32 to vector<1x1xf32>
    %280 = arith.mulf %97, %279 : vector<1x1xf32>
    %281 = arith.addf %277, %280 : vector<1x1xf32>
    %c65 = arith.constant 65 : index
    %282 = memref.load %arg2[%c65] : memref<74xf32, #tpu.memory_space<smem>>
    %283 = vector.broadcast %282 : f32 to vector<1x1xf32>
    %284 = arith.mulf %109, %283 : vector<1x1xf32>
    %285 = arith.addf %281, %284 : vector<1x1xf32>
    %c69 = arith.constant 69 : index
    %286 = memref.load %arg2[%c69] : memref<74xf32, #tpu.memory_space<smem>>
    %287 = vector.broadcast %286 : f32 to vector<1x1xf32>
    %288 = arith.mulf %121, %287 : vector<1x1xf32>
    %289 = arith.addf %285, %288 : vector<1x1xf32>
    %c73 = arith.constant 73 : index
    %290 = memref.load %arg2[%c73] : memref<74xf32, #tpu.memory_space<smem>>
    %291 = vector.broadcast %290 : f32 to vector<1x1xf32>
    %292 = arith.addf %289, %291 : vector<1x1xf32>
    %c3_19 = arith.constant 3 : index
    %c0_20 = arith.constant 0 : index
    %293 = vector.load %arg3[%c3_19, %c0_20] : memref<4x1xf32, #tpu.memory_space<vmem>>, vector<1x1xf32>
    tpu.vector_store %arg3[%c3_19, %c0_20], %292 {strides = array<i32>} : memref<4x1xf32, #tpu.memory_space<vmem>>, vector<1x1xf32>,
    return
  }
  func.func @transform_0(%arg0: i32) -> (i32, i32) {
    %c0_i32 = arith.constant 0 : i32
    %c0_i32_0 = arith.constant 0 : i32
    return %c0_i32, %arg0 : i32, i32
  }
  func.func @transform_1(%arg0: i32) -> i32 {
    %c0_i32 = arith.constant 0 : i32
    %c0_i32_0 = arith.constant 0 : i32
    return %c0_i32 : i32
  }
  func.func @transform_2(%arg0: i32) -> (i32, i32) {
    %c0_i32 = arith.constant 0 : i32
    %c0_i32_0 = arith.constant 0 : i32
    return %c0_i32, %arg0 : i32, i32
  }
}

</mosaic_0001>

<bundles_post_ra>
// kernel: tpu_custom_call.1
= control target key start
LH: loop header
LB: loop body
LE: loop exit
PB: predicated region body
PF: predicated region fallthrough
CT: control target
= control target key end

     0   :  { %7 = vsyncpa [#allocation3], 0  ;;  %s725_s0 = inlined_call_operand.vmem [shape: f32[2,1], index: 0, kind: input, shape index: {}]   ;;  %s726_s1 = inlined_call_operand.vmem [shape: f32[74], index: 1, kind: input, shape index: {}]   ;;  %s727_s2 = inlined_call_operand.vmem [shape: f32[4,1], index: 2, kind: output, shape index: {}]  }
   0x1   :  { %s16_s11 = sshll.u32 %s726_s1, 4  ;;  %s17_s11 = int_to_ptr.vmem [resolvable:$true] %s16_s11 }
   0x2   :  { %s388_s12 = scalar_lea.vmem %s17_s11, 16  ;;  %p393_p1 = scmp.lt.s32.totalorder %s17_s11, %s17_s11 }
   0x3   :  { %p389_p0 = scmp.ne.s32.totalorder %s17_s11, %s388_s12  ;;  %p394_p2 = scmp.lt.s32.totalorder %s388_s12, %s388_s12 }
   0x5   :  { %p395_p3 = por %p394_p2, %p393_p1 }
   0x7   :  { %p396_p4 = pnand %p395_p3, %p389_p0 }
   0x9   :  { %399 = shalt.err (!%p396_p4)
}
   0xa   :  { %s402_s13 = smov [#allocation2]  }
   0xb   :  { %19 = dma.vmem_to_smem %s17_s11, 16, %s402_s13, [#allocation3]  }
   0xc   :  { %400 = dma.done.wait [#allocation3], 16  }
   0xd   :  { %401 = vsyncadd [#allocation3], 4294967280 }
   0xe   :  { %23 = sfence }
   0xf   :  { %s26_s14 = sld [smem:[#allocation2]]  ;;  %s314_s15 = sld [smem:[#allocation2 + $0xa]]  ;;  %v428_v0 = vld [vmem:[%s725_s0] sm:$0x1]  ;;  %v435_v1 = vld [vmem:[%s725_s0 + $0x1] sm:$0x1] }
  0x10   :  { %s421_s16 = sld [smem:[#allocation2 + $0x14]]  ;;  %s316_s17 = sld [smem:[#allocation2 + $0x1]]  ;;  %vm178_vm0 = vcmask 0  }
  0x11   :  { %s317_s18 = sld [smem:[#allocation2 + $0xb]]  ;;  %s423_s1 = sld [smem:[#allocation2 + $0x15]] }
  0x12   :  { %s319_s19 = sld [smem:[#allocation2 + $0x2]]  ;;  %s320_s22 = sld [smem:[#allocation2 + $0xc]] }
  0x13   :  { %s430_s23 = sld [smem:[#allocation2 + $0x16]]  ;;  %s437_s26 = sld [smem:[#allocation2 + $0x3]] }
  0x14   :  { %s439_s27 = sld [smem:[#allocation2 + $0xd]]  ;;  %s441_s28 = sld [smem:[#allocation2 + $0x17]] }
  0x15   :  { %v27_v2 = vstv %s26_s14  ;;  %s443_s29 = sld [smem:[#allocation2 + $0x4]]  ;;  %v30_v4 = vstv %s314_s15  ;;  %s446_s30 = sld [smem:[#allocation2 + $0xe]] }
  0x16   :  { %v28_v3 = vmul.f32 %v27_v2, %v428_v0  ;;  %v31_v5 = vmul.f32 %v30_v4, %v435_v1  ;;  %v38_v6 = vstv %s316_s17  ;;  %s449_s0 = sld [smem:[#allocation2 + $0x5]]  ;;  %s451_s3 = sld [smem:[#allocation2 + $0xf]]  ;;  %v34_v8 = vstv %s421_s16 }
  0x17   :  { %v41_v7 = vstv %s317_s18  ;;  %v39_v9 = vmul.f32 %v38_v6, %v428_v0  ;;  %s456_s4 = sld [smem:[#allocation2 + $0x18]]  ;;  %s458_s5 = sld [smem:[#allocation2 + $0x6]]  ;;  %v45_v13 = vstv %s423_s1 }
  0x18   :  { %v42_v10 = vmul.f32 %v41_v7, %v435_v1  ;;  %v49_v11 = vstv %s319_s19  ;;  %v32_v12 = vadd.f32 %v31_v5, %v28_v3  ;;  %v52_v15 = vstv %s320_s22  ;;  %s462_s6 = sld [smem:[#allocation2 + $0x10]]  ;;  %s467_s7 = sld [smem:[#allocation2 + $0x19]] }
  0x19   :  { %v50_v14 = vmul.f32 %v49_v11, %v428_v0  ;;  %v53_v17 = vmul.f32 %v52_v15, %v435_v1  ;;  %v60_v18 = vstv %s437_s26  ;;  %s469_s8 = sld [smem:[#allocation2 + $0x7]]  ;;  %v56_v21 = vstv %s430_s23  ;;  %s474_s9 = sld [smem:[#allocation2 + $0x1a]] }
  0x1a   :  { %v43_v16 = vadd.f32 %v42_v10, %v39_v9  ;;  %v63_v19 = vstv %s439_s27  ;;  %v35_v20 = vadd.f32 %v34_v8, %v32_v12  ;;  %v61_v22 = vmul.f32 %v60_v18, %v428_v0  ;;  %s476_s10 = sld [smem:[#allocation2 + $0x11]]  ;;  %s481_s11 = sld [smem:[#allocation2 + $0x1b]] }
  0x1b   :  { %v64_v23 = vmul.f32 %v63_v19, %v435_v1  ;;  %v54_v24 = vadd.f32 %v53_v17, %v50_v14  ;;  %v67_v25 = vstv %s441_s28  ;;  %v71_v26 = vstv %s443_s29  ;;  %s483_s12 = sld [smem:[#allocation2 + $0x8]]  ;;  %s487_s13 = sld [smem:[#allocation2 + $0x12]] }
  0x1c   :  { %v74_v27 = vstv %s446_s30  ;;  %v46_v28 = vadd.f32 %v45_v13, %v43_v16  ;;  %v72_v30 = vmul.f32 %v71_v26, %v428_v0  ;;  %s489_s14 = sld [smem:[#allocation2 + $0x9]]  ;;  %v82_v33 = vstv %s449_s0  ;;  %s492_s15 = sld [smem:[#allocation2 + $0x1c]] }
  0x1d   :  { %v65_v29 = vadd.f32 %v64_v23, %v61_v22  ;;  %v75_v31 = vmul.f32 %v74_v27, %v435_v1  ;;  %v57_v32 = vadd.f32 %v56_v21, %v54_v24  ;;  %v83_v36 = vmul.f32 %v82_v33, %v428_v0  ;;  %s496_s16 = sld [smem:[#allocation2 + $0x13]]  ;;  %s498_s17 = sld [smem:[#allocation2 + $0x1e]] }
  0x1e   :  { %v85_v37 = vstv %s451_s3  ;;  %v500_v38 = vmax.f32 %v35_v20, 0.0  ;;  %v78_v39 = vstv %s456_s4  ;;  %v93_v41 = vstv %s458_s5  ;;  %s505_s18 = sld [smem:[#allocation2 + $0x1d]]  ;;  %s507_s1 = sld [smem:[#allocation2 + $0x22]] }
  0x1f   :  { %v68_v34 = vadd.f32 %v67_v25, %v65_v29  ;;  %v76_v35 = vadd.f32 %v75_v31, %v72_v30  ;;  %v86_v40 = vmul.f32 %v85_v37, %v435_v1  ;;  %v509_v42 = vmax.f32 %v46_v28, 0.0  ;;  %s515_s19 = sld [smem:[#allocation2 + $0x26]]  ;;  %s517_s20 = sld [smem:[#allocation2 + $0x2a]] }
  0x20   :  { %v511_v43 = vmax.f32 %v57_v32, 0.0  ;;  %v94_v44 = vmul.f32 %v93_v41, %v428_v0  ;;  %v96_v45 = vstv %s462_s6  ;;  %v89_v47 = vstv %s467_s7  ;;  %s526_s21 = sld [smem:[#allocation2 + $0x2e]]  ;;  %s531_s22 = sld [smem:[#allocation2 + $0x32]] }
  0x21   :  { %v87_v46 = vadd.f32 %v86_v40, %v83_v36  ;;  %v97_v48 = vmul.f32 %v96_v45, %v435_v1  ;;  %v104_v49 = vstv %s469_s8  ;;  %v522_v50 = vmax.f32 %v68_v34, 0.0  ;;  %s539_s23 = sld [smem:[#allocation2 + $0x36]]  ;;  %s541_s24 = sld [smem:[#allocation2 + $0x3a]] }
  0x22   :  { %v79_v51 = vadd.f32 %v78_v39, %v76_v35  ;;  %v105_v52 = vmul.f32 %v104_v49, %v428_v0  ;;  %v107_v53 = vstv %s476_s10  ;;  %v100_v55 = vstv %s474_s9  ;;  %s546_s25 = sld [smem:[#allocation2 + $0x3e]]  ;;  %s548_s26 = sld [smem:[#allocation2 + $0x1f]] }
  0x23   :  { %v98_v54 = vadd.f32 %v97_v48, %v94_v44  ;;  %v108_v56 = vmul.f32 %v107_v53, %v435_v1  ;;  %v115_v57 = vstv %s483_s12  ;;  %v111_v58 = vstv %s481_s11  ;;  %s552_s27 = sld [smem:[#allocation2 + $0x23]]  ;;  %s558_s28 = sld [smem:[#allocation2 + $0x27]] }
  0x24   :  { %v116_v59 = vmul.f32 %v115_v57, %v428_v0  ;;  %v118_v60 = vstv %s487_s13  ;;  %v126_v61 = vstv %s489_s14  ;;  %v90_v62 = vadd.f32 %v89_v47, %v87_v46  ;;  %s560_s29 = sld [smem:[#allocation2 + $0x2b]]  ;;  %s565_s30 = sld [smem:[#allocation2 + $0x42]] }
  0x25   :  { %v109_v63 = vadd.f32 %v108_v56, %v105_v52  ;;  %v119_v2 = vmul.f32 %v118_v60, %v435_v1  ;;  %v122_v3 = vstv %s492_s15  ;;  %v101_v4 = vadd.f32 %v100_v55, %v98_v54  ;;  %s567_s0 = sld [smem:[#allocation2 + $0x2f]]  ;;  %s573_s3 = sld [smem:[#allocation2 + $0x33]] }
  0x26   :  { %v127_v5 = vmul.f32 %v126_v61, %v428_v0  ;;  %v129_v6 = vstv %s496_s16  ;;  %v137_v7 = vstv %s498_s17  ;;  %v133_v11 = vstv %s505_s18  ;;  %s575_s4 = sld [smem:[#allocation2 + $0x37]]  ;;  %s583_s5 = sld [smem:[#allocation2 + $0x3b]] }
  0x27   :  { %v112_v8 = vadd.f32 %v111_v58, %v109_v63  ;;  %v120_v9 = vadd.f32 %v119_v2, %v116_v59  ;;  %v130_v10 = vmul.f32 %v129_v6, %v435_v1  ;;  %v138_v12 = vmul.f32 %v137_v7, %v500_v38  ;;  %s589_s6 = sld [smem:[#allocation2 + $0x20]]  ;;  %s595_s7 = sld [smem:[#allocation2 + $0x24]] }
  0x28   :  { %v140_v13 = vstv %s507_s1  ;;  %v144_v14 = vstv %s515_s19  ;;  %v148_v15 = vstv %s517_s20  ;;  %v562_v0 = vmax.f32 %v79_v51, 0.0  ;;  %s597_s8 = sld [smem:[#allocation2 + $0x28]]  ;;  %s603_s9 = sld [smem:[#allocation2 + $0x3f]] }
  0x29   :  { %v123_v16 = vadd.f32 %v122_v3, %v120_v9  ;;  %v131_v17 = vadd.f32 %v130_v10, %v127_v5  ;;  %v141_v1 = vmul.f32 %v140_v13, %v509_v42  ;;  %v569_v18 = vmax.f32 %v90_v62, 0.0  ;;  %s605_s10 = sld [smem:[#allocation2 + $0x2c]]  ;;  %s611_s11 = sld [smem:[#allocation2 + $0x43]] }
  0x2a   :  { %v145_v19 = vmul.f32 %v144_v14, %v511_v43  ;;  %v152_v20 = vstv %s526_s21  ;;  %v149_v23 = vmul.f32 %v148_v15, %v522_v50  ;;  %v156_v24 = vstv %s531_s22  ;;  %s613_s12 = sld [smem:[#allocation2 + $0x30]]  ;;  %s618_s13 = sld [smem:[#allocation2 + $0x34]] }
  0x2b   :  { %v134_v21 = vadd.f32 %v133_v11, %v131_v17  ;;  %v142_v22 = vadd.f32 %v141_v1, %v138_v12  ;;  %v579_v25 = vmax.f32 %v101_v4, 0.0  ;;  %v581_v26 = vmax.f32 %v112_v8, 0.0  ;;  %s620_s14 = sld [smem:[#allocation2 + $0x46]]  ;;  %s625_s15 = sld [smem:[#allocation2 + $0x38]] }
  0x2c   :  { %v585_v27 = vmax.f32 %v123_v16, 0.0  ;;  %v153_v29 = vmul.f32 %v152_v20, %v562_v0  ;;  %v160_v30 = vstv %s539_s23  ;;  %v157_v31 = vmul.f32 %v156_v24, %v569_v18  ;;  %s632_s16 = sld [smem:[#allocation2 + $0x3c]]  ;;  %s637_s17 = sld [smem:[#allocation2 + $0x21]] }
  0x2d   :  { %v146_v28 = vadd.f32 %v145_v19, %v142_v22  ;;  %v164_v32 = vstv %s541_s24  ;;  %v168_v33 = vstv %s546_s25  ;;  %v181_v34 = vstv %s548_s26  ;;  %s642_s18 = sld [smem:[#allocation2 + $0x25]]  ;;  %s644_s1 = sld [smem:[#allocation2 + $0x29]] }
  0x2e   :  { %v599_v35 = vmax.f32 %v134_v21, 0.0  ;;  %v182_v37 = vmul.f32 %v181_v34, %v500_v38  ;;  %v184_v39 = vstv %s552_s27  ;;  %v161_v40 = vmul.f32 %v160_v30, %v579_v25  ;;  %s646_s19 = sld [smem:[#allocation2 + $0x47]]  ;;  %s651_s20 = sld [smem:[#allocation2 + $0x2d]] }
  0x2f   :  { %v150_v36 = vadd.f32 %v149_v23, %v146_v28  ;;  %v185_v41 = vmul.f32 %v184_v39, %v509_v42  ;;  %v188_v44 = vstv %s558_s28  ;;  %v192_v45 = vstv %s560_s29  ;;  %s656_s21 = sld [smem:[#allocation2 + $0x40]]  ;;  %s658_s22 = sld [smem:[#allocation2 + $0x31]] }
  0x30   :  { %v172_v47 = vstv %s565_s30  ;;  %v189_v48 = vmul.f32 %v188_v44, %v511_v43  ;;  %v196_v49 = vstv %s567_s0  ;;  %v193_v52 = vmul.f32 %v192_v45, %v522_v50  ;;  %s665_s23 = sld [smem:[#allocation2 + $0x44]]  ;;  %s667_s24 = sld [smem:[#allocation2 + $0x35]] }
  0x31   :  { %v154_v46 = vadd.f32 %v153_v29, %v150_v36  ;;  %v186_v51 = vadd.f32 %v185_v41, %v182_v37  ;;  %v200_v53 = vstv %s573_s3  ;;  %v204_v54 = vstv %s575_s4  ;;  %s674_s25 = sld [smem:[#allocation2 + $0x39]]  ;;  %s681_s26 = sld [smem:[#allocation2 + $0x3d]] }
  0x32   :  { %v165_v56 = vmul.f32 %v164_v32, %v581_v26  ;;  %v169_v57 = vmul.f32 %v168_v33, %v585_v27  ;;  %v173_v58 = vmul.f32 %v172_v47, %v599_v35  ;;  %v197_v60 = vmul.f32 %v196_v49, %v562_v0  ;;  %s692_s29 = sld [smem:[#allocation2 + $0x48]]  ;;  %s695_s30 = sld [smem:[#allocation2 + $0x41]] }
  0x33   :  { %v158_v55 = vadd.f32 %v157_v31, %v154_v46  ;;  %v190_v59 = vadd.f32 %v189_v48, %v186_v51  ;;  %v208_v61 = vstv %s583_s5  ;;  %v201_v63 = vmul.f32 %v200_v53, %v569_v18  ;;  %s385_s0 = sld [smem:[#allocation2 + $0x45]]  ;;  %s386_s5 = sld [smem:[#allocation2 + $0x49]] }
  0x34   :  { %v205_v2 = vmul.f32 %v204_v54, %v579_v25  ;;  %v224_v3 = vstv %s589_s6  ;;  %v227_v6 = vstv %s595_s7  ;;  %v231_v7 = vstv %s597_s8 }
  0x35   :  { %v162_v62 = vadd.f32 %v161_v40, %v158_v55  ;;  %v194_v4 = vadd.f32 %v193_v52, %v190_v59  ;;  %v225_v5 = vmul.f32 %v224_v3, %v500_v38  ;;  %v228_v9 = vmul.f32 %v227_v6, %v509_v42 }
  0x36   :  { %v232_v10 = vmul.f32 %v231_v7, %v511_v43  ;;  %v235_v11 = vstv %s605_s10  ;;  %v212_v13 = vstv %s603_s9  ;;  %v216_v14 = vstv %s611_s11 }
  0x37   :  { %v166_v8 = vadd.f32 %v165_v56, %v162_v62  ;;  %v198_v12 = vadd.f32 %v197_v60, %v194_v4  ;;  %v239_v15 = vstv %s613_s12  ;;  %v229_v17 = vadd.f32 %v228_v9, %v225_v5 }
  0x38   :  { %v236_v1 = vmul.f32 %v235_v11, %v522_v50  ;;  %v243_v19 = vstv %s618_s13  ;;  %v176_v20 = vstv %s620_s14  ;;  %v209_v22 = vmul.f32 %v208_v61, %v581_v26 }
  0x39   :  { %v170_v16 = vadd.f32 %v169_v57, %v166_v8  ;;  %v202_v21 = vadd.f32 %v201_v63, %v198_v12  ;;  %v247_v23 = vstv %s625_s15  ;;  %v213_v28 = vmul.f32 %v212_v13, %v585_v27 }
  0x3a   :  { %v233_v29 = vadd.f32 %v232_v10, %v229_v17  ;;  %v240_v30 = vmul.f32 %v239_v15, %v562_v0  ;;  %v217_v32 = vmul.f32 %v216_v14, %v599_v35  ;;  %v244_v33 = vmul.f32 %v243_v19, %v569_v18 }
  0x3b   :  { %v174_v24 = vadd.f32 %v173_v58, %v170_v16  ;;  %v206_v31 = vadd.f32 %v205_v2, %v202_v21  ;;  %v251_v34 = vstv %s632_s16  ;;  %v248_v39 = vmul.f32 %v247_v23, %v579_v25 }
  0x3c   :  { %v237_v37 = vadd.f32 %v236_v1, %v233_v29  ;;  %v267_v40 = vstv %s637_s17  ;;  %v270_v45 = vstv %s642_s18  ;;  %v274_v46 = vstv %s644_s1 }
  0x3d   :  { %v177_v36 = vadd.f32 %v176_v20, %v174_v24  ;;  %v210_v41 = vadd.f32 %v209_v22, %v206_v31  ;;  %v268_v44 = vmul.f32 %v267_v40, %v500_v38  ;;  %v271_v48 = vmul.f32 %v270_v45, %v509_v42 }
  0x3e   :  { %v241_v47 = vadd.f32 %v240_v30, %v237_v37  ;;  %v275_v49 = vmul.f32 %v274_v46, %v511_v43  ;;  %v278_v51 = vstv %s651_s20  ;;  %v220_v53 = vstv %s646_s19 }
  0x3f   :  { %179 = vst.msk [vmem:[%s727_s2] sm:$0x1] %vm178_vm0, %v177_v36  ;;  %v214_v52 = vadd.f32 %v213_v28, %v210_v41  ;;  %v255_v38 = vstv %s656_s21  ;;  %v282_v54 = vstv %s658_s22  ;;  %v252_v56 = vmul.f32 %v251_v34, %v581_v26 }
  0x40   :  { %v245_v55 = vadd.f32 %v244_v33, %v241_v47  ;;  %v272_v57 = vadd.f32 %v271_v48, %v268_v44  ;;  %v279_v58 = vmul.f32 %v278_v51, %v522_v50  ;;  %v259_v59 = vstv %s665_s23 }
  0x41   :  { %v218_v42 = vadd.f32 %v217_v32, %v214_v52  ;;  %v286_v43 = vstv %s667_s24  ;;  %v256_v61 = vmul.f32 %v255_v38, %v585_v27  ;;  %v283_v63 = vmul.f32 %v282_v54, %v562_v0 }
  0x42   :  { %v249_v60 = vadd.f32 %v248_v39, %v245_v55  ;;  %v276_v62 = vadd.f32 %v275_v49, %v272_v57  ;;  %v290_v3 = vstv %s674_s25  ;;  %v260_v5 = vmul.f32 %v259_v59, %v599_v35 }
  0x43   :  { %v221_v2 = vadd.f32 %v220_v53, %v218_v42  ;;  %v287_v50 = vmul.f32 %v286_v43, %v569_v18  ;;  %v294_v7 = vstv %s681_s26  ;;  %v291_v10 = vmul.f32 %v290_v3, %v579_v25 }
  0x44   :  { %v253_v4 = vadd.f32 %v252_v56, %v249_v60  ;;  %v280_v6 = vadd.f32 %v279_v58, %v276_v62  ;;  %v263_v11 = vstv %s692_s29  ;;  %v298_v0 = vstv %s695_s30 }
  0x45   :  { %222 = vst.msk [vmem:[%s727_s2 + $0x1] sm:$0x1] %vm178_vm0, %v221_v2  ;;  %v295_v14 = vmul.f32 %v294_v7, %v581_v26  ;;  %v302_v15 = vstv %s385_s0  ;;  %v299_v17 = vmul.f32 %v298_v0, %v585_v27  ;;  %v306_v20 = vstv %s386_s5 }
  0x46   :  { %v257_v8 = vadd.f32 %v256_v61, %v253_v4  ;;  %v284_v9 = vadd.f32 %v283_v63, %v280_v6  ;;  %v303_v25 = vmul.f32 %v302_v15, %v599_v35 }
  0x48   :  { %v261_v12 = vadd.f32 %v260_v5, %v257_v8  ;;  %v288_v13 = vadd.f32 %v287_v50, %v284_v9 }
  0x4a   :  { %v264_v16 = vadd.f32 %v263_v11, %v261_v12  ;;  %v292_v18 = vadd.f32 %v291_v10, %v288_v13 }
  0x4c   :  { %265 = vst.msk [vmem:[%s727_s2 + $0x2] sm:$0x1] %vm178_vm0, %v264_v16  ;;  %v296_v1 = vadd.f32 %v295_v14, %v292_v18 }
  0x4e   :  { %v300_v19 = vadd.f32 %v299_v17, %v296_v1 }
  0x50   :  { %v304_v21 = vadd.f32 %v303_v25, %v300_v19 }
  0x52   :  { %v307_v22 = vadd.f32 %v306_v20, %v304_v21 }
  0x54   :  { %308 = vst.msk [vmem:[%s727_s2 + $0x3] sm:$0x1] %vm178_vm0, %v307_v22 }
  0x55   :  { %313 = vsyncpa [#allocation3], 1 }

</bundles_post_ra>
